<compile_context>
chip_gen: v5e
topology: v5e:2x2
jax: 0.10.0
libtpu: 0.0.40
codegen_flags: <defaults>
</compile_context>

<pallas_src>
import functools
from typing import NamedTuple

import jax
import jax.numpy as jnp
from jax.experimental import pallas as pl
from jax.experimental.pallas import tpu as pltpu

_NEG_BIG = -1e30  # plain Python float -> jaxpr literal (NOT a captured array)


# --------------------------------------------------------------------------
# Kernel
# --------------------------------------------------------------------------
def bahdanau_kernel(q_ref, pk_ref, enc_ref, len_ref, wqt_ref, we_ref,
                    ctx_ref, alpha_ref, *, tanh_in_stream_dtype):
    """One grid step == one batch block of Bt rows."""
    q = q_ref[...]                                      # [Bt, Q] f32
    wqt = wqt_ref[...]                                  # [Q, H]  f32 (pre-transposed)

    # query_layer(query): [Bt, Q] @ [Q, H] -> [Bt, H] on the MXU.
    qp = jnp.dot(q, wqt, preferred_element_type=jnp.float32)

    # energy_layer(tanh(query + proj_key)); pk streams in bf16 by default.
    pk = pk_ref[...]                                    # [Bt, M, H] stream dtype
    if tanh_in_stream_dtype:
        # optional v6e/v7x EUP relief: add + tanh in bf16, upcast afterwards
        e = jnp.tanh(qp.astype(pk.dtype)[:, None, :] + pk).astype(jnp.float32)
    else:
        e = jnp.tanh(qp[:, None, :] + pk.astype(jnp.float32))

    # scores land directly in [Bt, M] layout via VPU multiply + lane reduce
    # (avoids the degenerate [M,H]@[H,1] matmul and the [M,1]->[1,M] relayout).
    we_row = we_ref[...].reshape(1, 1, -1)              # [1, 1, H]
    scores = jnp.sum(e * we_row, axis=-1)               # [Bt, M]

    # masked_fill(mask == 0, -inf), rebuilt from per-row lengths (iota compare)
    # with a finite sentinel so padded / fully-masked rows never produce NaNs.
    lens = len_ref[...]                                 # [Bt, 1] int32
    pos = jax.lax.broadcasted_iota(jnp.int32, scores.shape, 1)
    scores = jnp.where(pos < lens, scores, _NEG_BIG)

    # softmax over the lane-aligned M axis; reciprocal routed to the EUP slot.
    smax = jnp.max(scores, axis=-1, keepdims=True)
    ex = jnp.exp(scores - smax)
    alphas = ex * pl.reciprocal(jnp.sum(ex, axis=-1, keepdims=True), approx=True)
    alpha_ref[...] = alphas.astype(alpha_ref.dtype)     # [Bt, M] dense slab

    # context = bmm(alphas, encoder_hidden) as broadcast-multiply + sublane
    # reduce over M (M is small; keeps v5e off a degenerate-row MXU op).
    enc = enc_ref[...].astype(jnp.float32)              # [Bt, M, V]
    ctx_ref[...] = jnp.sum(alphas[:, :, None] * enc, axis=1).astype(ctx_ref.dtype)


# --------------------------------------------------------------------------
# Host-side helpers
# --------------------------------------------------------------------------
def _round_up(x, m):
    return ((x + m - 1) // m) * m


def _pad_batch(x, target_b):
    b = x.shape[0]
    if b == target_b:
        return x
    pad = [(0, target_b - b)] + [(0, 0)] * (x.ndim - 1)
    return jnp.pad(x, pad)


def _choose_block_b(B, M, H, V, Q, stream_itemsize, vmem_budget_bytes,
                    max_block=512):
    """Largest Bt (multiple of 8, <=512) whose working set fits the budget."""
    per_row = (
        2 * M * (H + V) * stream_itemsize          # double-buffered pk / enc
        + 2 * (Q + 1) * 4                          # double-buffered query + lengths
        + 2 * (V + M) * 4                          # double-buffered outputs
        + (2 * M * H + M * V + 4 * M + H + V) * 4  # live f32 temps (tanh, upcasts, softmax)
    )
    fixed = (Q * H + H) * 4 * 2                    # resident weights (worst case 2 bufs)
    usable = int(vmem_budget_bytes * 0.8) - fixed  # ~20% headroom
    bt = usable // max(per_row, 1)
    bt = int(min(bt, max_block, _round_up(B, 8)))
    bt = max(8, (bt // 8) * 8)
    # Prefer an even (and >= 2) number of batch blocks so v7x's two TensorCores
    # both get work (the batch axis is marked "parallel").
    nblk = (B + bt - 1) // bt
    if B > 8 and nblk % 2 == 1:
        nblk += 1
        bt = max(8, _round_up((B + nblk - 1) // nblk, 8))
    return bt


class PreparedBahdanau(NamedTuple):
    proj_key: jax.Array        # [Bp, M, H]  stream dtype (bf16 by default)
    encoder_hidden: jax.Array  # [Bp, M, V]  stream dtype
    lengths: jax.Array         # [Bp, 1]     int32 (0 for padded batch rows)
    wqt: jax.Array             # [Q, H]      f32 (pre-transposed query weight)
    we: jax.Array              # [1, H]      f32 (energy weight)
    batch: int
    block_b: int
    vmem_limit_bytes: int
    tanh_in_stream_dtype: bool


def prepare_bahdanau(proj_key, encoder_hidden, mask, wq, we, *,
                     lengths=None,
                     block_b=None,
                     stream_dtype=jnp.bfloat16,
                     vmem_budget_bytes=40 * 2**20,
                     tanh_in_stream_dtype=False):
    """One-time (per source sequence) preparation.

    Hoists the batch padding, bf16 cast of the two large HBM-streamed tensors
    and the weight transpose out of the per-decoder-step call, so they are not
    re-materialized in HBM on every step.

    vmem_budget_bytes: VMEM working-set budget used to size Bt. 40 MiB is safe
    on all of v5e/v6e (128 MiB physical) and v7x (64 MiB physical); raise to
    ~96 MiB on v5e/v6e for even larger blocks.
    """
    B, M, H = proj_key.shape
    V = encoder_hidden.shape[-1]
    wqt = jnp.asarray(wq, jnp.float32).T               # [Q, H], one-time transpose
    Q = wqt.shape[0]

    if lengths is None:
        # TODO(synk): this assumes the usual prefix-style padding mask of the
        # seq2seq model; a general non-contiguous mask would need the full
        # [B, M] mask streamed instead of compact lengths.
        lengths = jnp.sum(jnp.asarray(mask).reshape(B, M).astype(jnp.int32), axis=-1)
    lengths = jnp.asarray(lengths, jnp.int32).reshape(B, 1)

    itemsize = jnp.dtype(stream_dtype).itemsize if stream_dtype is not None else 4
    if block_b is None:
        block_b = _choose_block_b(B, M, H, V, Q, itemsize, vmem_budget_bytes)
    block_b = max(8, (int(block_b) // 8) * 8)
    block_b = min(block_b, _round_up(B, 8))
    Bp = _round_up(B, block_b)

    pk = _pad_batch(jnp.asarray(proj_key), Bp)
    enc = _pad_batch(jnp.asarray(encoder_hidden), Bp)
    if stream_dtype is not None:
        pk = pk.astype(stream_dtype)
        enc = enc.astype(stream_dtype)
    lens = _pad_batch(lengths, Bp)                     # padded rows -> length 0

    vmem_limit = int(min(int(vmem_budget_bytes) + (16 << 20), 128 << 20))
    return PreparedBahdanau(
        proj_key=pk, encoder_hidden=enc, lengths=lens,
        wqt=wqt, we=jnp.asarray(we, jnp.float32).reshape(1, -1),
        batch=B, block_b=block_b, vmem_limit_bytes=vmem_limit,
        tanh_in_stream_dtype=bool(tanh_in_stream_dtype and stream_dtype is not None))


def bahdanau_attention_step(query, prep: PreparedBahdanau):
    """Per-decoder-step forward: query [B,1,Q] -> (context [B,1,V], alphas [B,1,M])."""
    B, Bt = prep.batch, prep.block_b
    Bp, M, H = prep.proj_key.shape
    V = prep.encoder_hidden.shape[-1]
    Q = prep.wqt.shape[0]

    q2d = _pad_batch(jnp.asarray(query).reshape(B, Q).astype(jnp.float32), Bp)

    itemsize = jnp.dtype(prep.proj_key.dtype).itemsize
    cost = pl.CostEstimate(
        flops=2 * Bp * (Q * H + M * H + M * V),
        transcendentals=Bp * M * (H + 1),                      # tanh + exp
        bytes_accessed=(Bp * Q * 4 + Bp * M * (H + V) * itemsize + Bp * 4
                        + Q * H * 4 + H * 4 + Bp * (V + M) * 4),
    )

    kernel = functools.partial(bahdanau_kernel,
                               tanh_in_stream_dtype=prep.tanh_in_stream_dtype)

    def run(single_buffer_weights):
        def weight_spec(shape):
            idx = lambda b: (0,) * len(shape)
            if single_buffer_weights:
                # Grid-invariant weights: single buffer -> VMEM goes to Bt.
                return pl.BlockSpec(shape, idx, pipeline_mode=pl.Buffered(1))
            return pl.BlockSpec(shape, idx)

        grid_spec = pltpu.PrefetchScalarGridSpec(
            num_scalar_prefetch=0,
            grid=(Bp // Bt,),
            in_specs=[
                pl.BlockSpec((Bt, Q), lambda b: (b, 0)),        # query (2-D)
                pl.BlockSpec((Bt, M, H), lambda b: (b, 0, 0)),  # proj_key
                pl.BlockSpec((Bt, M, V), lambda b: (b, 0, 0)),  # encoder_hidden
                pl.BlockSpec((Bt, 1), lambda b: (b, 0)),        # per-row lengths
                weight_spec((Q, H)),                            # W_query^T (resident)
                weight_spec((1, H)),                            # W_energy   (resident)
            ],
            out_specs=[
                pl.BlockSpec((Bt, V), lambda b: (b, 0)),        # context slab
                pl.BlockSpec((Bt, M), lambda b: (b, 0)),        # alphas slab
            ],
        )
        return pl.pallas_call(
            kernel,
            out_shape=(jax.ShapeDtypeStruct((Bp, V), jnp.float32),
                       jax.ShapeDtypeStruct((Bp, M), jnp.float32)),
            grid_spec=grid_spec,
            compiler_params=pltpu.CompilerParams(
                dimension_semantics=("parallel",),              # v7x: 2 TCs split batch
                vmem_limit_bytes=prep.vmem_limit_bytes),
            cost_estimate=cost,
        )(q2d, prep.proj_key, prep.encoder_hidden, prep.lengths, prep.wqt, prep.we)

    try:
        ctx2d, alpha2d = run(single_buffer_weights=True)
    except Exception:
        # pl.Buffered(1) on grid-invariant inputs is not supported on every
        # jax/Pallas build; fall back to the default double buffering.
        ctx2d, alpha2d = run(single_buffer_weights=False)

    context = ctx2d[:B].reshape(B, 1, V)
    alphas = alpha2d[:B].reshape(B, 1, M)
    return context, alphas


def bahdanau_attention(query, proj_key, encoder_hidden, mask, wq, we,
                       **prep_kwargs):
    """One-shot convenience wrapper (prepare + single step)."""
    prep = prepare_bahdanau(proj_key, encoder_hidden, mask, wq, we, **prep_kwargs)
    return bahdanau_attention_step(query, prep)


# --------------------------------------------------------------------------
# Pure-JAX reference (word_bias=False path of the PyTorch module)
# --------------------------------------------------------------------------
def reference(query, proj_key, encoder_hidden, mask, wq, we):
    qp = jnp.einsum("bik,hk->bih", query, wq)                         # [B,1,H]
    scores = jnp.einsum("bmh,oh->bmo", jnp.tanh(qp + proj_key), we)   # [B,M,1]
    scores = jnp.transpose(scores, (0, 2, 1))                         # [B,1,M]
    scores = jnp.where(mask == 0, -jnp.inf, scores)
    alphas = jax.nn.softmax(scores, axis=-1)
    context = jnp.einsum("bim,bmv->biv", alphas, encoder_hidden)
    return context, alphas


if __name__ == "__main__":
    B, M, H = 2, 8, 32
    Q = H            # query_size = hidden_size
    V = 2 * H        # key_size   = 2 * hidden_size (bidirectional encoder)

    key = jax.random.PRNGKey(0)
    k1, k2, k3, k4, k5 = jax.random.split(key, 5)

    query = jax.random.normal(k1, (B, 1, Q), dtype=jnp.float32)
    proj_key = jax.random.normal(k2, (B, M, H), dtype=jnp.float32)
    encoder_hidden = jax.random.normal(k3, (B, M, V), dtype=jnp.float32)

    # weights in nn.Linear layout: [out_features, in_features]
    wq = jax.random.normal(k4, (H, Q), dtype=jnp.float32) * 0.1
    we = jax.random.normal(k5, (1, H), dtype=jnp.float32) * 0.1

    # mask: first batch keeps 6 tokens, second keeps all 8
    lengths = jnp.array([6, 8], dtype=jnp.int32)
    mask = (jnp.arange(M)[None, None, :] < lengths[:, None, None]).astype(jnp.int32)

    ctx_ref, alphas_ref = reference(query, proj_key, encoder_hidden, mask, wq, we)

    # Exact (f32-streamed) path via the one-shot wrapper.
    ctx, alphas = bahdanau_attention(query, proj_key, encoder_hidden, mask, wq, we,
                                     stream_dtype=None)
    jax.block_until_ready((ctx, alphas))
    assert jnp.allclose(ctx, ctx_ref, atol=2e-3, rtol=2e-3)
    assert jnp.allclose(alphas, alphas_ref, atol=2e-3, rtol=2e-3)

    # Default path: bf16-streamed pk/enc, prepared ONCE and reused across
    # decoder steps (pad / cast / transpose hoisted out of the step call).
    prep = prepare_bahdanau(proj_key, encoder_hidden, mask, wq, we)
    ctx_bf, alphas_bf = bahdanau_attention_step(query, prep)
    ctx_bf2, alphas_bf2 = bahdanau_attention_step(query * 0.5, prep)  # 2nd step reuse
    jax.block_until_ready((ctx_bf, alphas_bf, ctx_bf2, alphas_bf2))
    assert jnp.allclose(ctx_bf, ctx_ref, atol=5e-2, rtol=5e-2)
    assert jnp.allclose(alphas_bf, alphas_ref, atol=5e-2, rtol=5e-2)

    print("KERNEL_OK")
</pallas_src>

<mosaic_0001>
module attributes {stable_mosaic.version = 11 : i64} {
  func.func @bahdanau_kernel(%arg0: i32, %arg1: memref<8x32xf32, #tpu.memory_space<vmem>>, %arg2: memref<8x8x32xf32, #tpu.memory_space<vmem>>, %arg3: memref<8x8x64xf32, #tpu.memory_space<vmem>>, %arg4: memref<8x1xi32, #tpu.memory_space<vmem>>, %arg5: memref<32x32xf32, #tpu.memory_space<vmem>>, %arg6: memref<1x32xf32, #tpu.memory_space<vmem>>, %arg7: memref<8x64xf32, #tpu.memory_space<vmem>>, %arg8: memref<8x8xf32, #tpu.memory_space<vmem>>) attributes {dimension_semantics = [#tpu.dimension_semantics<parallel>], iteration_bounds = array<i64: 1>, scalar_prefetch = 0 : i64, scratch_operands = 0 : i64, tpu.core_type = #tpu.core_type<tc>, window_params = [{transform_indices = @transform_0, window_bounds = array<i64: 8, 32>}, {transform_indices = @transform_1, window_bounds = array<i64: 8, 8, 32>}, {transform_indices = @transform_2, window_bounds = array<i64: 8, 8, 64>}, {transform_indices = @transform_3, window_bounds = array<i64: 8, 1>}, {pipeline_mode = #tpu.pipeline_mode<synchronous>, transform_indices = @transform_4, window_bounds = array<i64: 32, 32>}, {pipeline_mode = #tpu.pipeline_mode<synchronous>, transform_indices = @transform_5, window_bounds = array<i64: 1, 32>}, {transform_indices = @transform_6, window_bounds = array<i64: 8, 64>}, {transform_indices = @transform_7, window_bounds = array<i64: 8, 8>}]} {
    %c0 = arith.constant 0 : index
    %c0_0 = arith.constant 0 : index
    %0 = vector.load %arg1[%c0, %c0_0] : memref<8x32xf32, #tpu.memory_space<vmem>>, vector<8x32xf32>
    %c0_1 = arith.constant 0 : index
    %c0_2 = arith.constant 0 : index
    %1 = vector.load %arg5[%c0_1, %c0_2] : memref<32x32xf32, #tpu.memory_space<vmem>>, vector<32x32xf32>
    %cst = arith.constant dense<0.000000e+00> : vector<8x32xf32>
    %2 = tpu.matmul %0, %1, %cst {dimension_numbers = #tpu.dot_dimension_numbers<[1], [0], [0], [1], [0, 0, 1, 1], [], []>} : vector<8x32xf32>, vector<32x32xf32>, vector<8x32xf32> -> vector<8x32xf32>
    %c0_3 = arith.constant 0 : index
    %c0_4 = arith.constant 0 : index
    %c0_5 = arith.constant 0 : index
    %3 = vector.load %arg2[%c0_3, %c0_4, %c0_5] : memref<8x8x32xf32, #tpu.memory_space<vmem>>, vector<8x8x32xf32>
    %4 = vector.shape_cast %2 : vector<8x32xf32> to vector<8x1x32xf32>
    %5 = vector.broadcast %4 : vector<8x1x32xf32> to vector<8x8x32xf32>
    %6 = arith.addf %5, %3 : vector<8x8x32xf32>
    %7 = math.tanh %6 : vector<8x8x32xf32>
    %c0_6 = arith.constant 0 : index
    %c0_7 = arith.constant 0 : index
    %8 = vector.load %arg6[%c0_6, %c0_7] : memref<1x32xf32, #tpu.memory_space<vmem>>, vector<1x32xf32>
    %9 = vector.shape_cast %8 : vector<1x32xf32> to vector<1x1x32xf32>
    %10 = vector.broadcast %9 : vector<1x1x32xf32> to vector<8x8x32xf32>
    %11 = arith.mulf %7, %10 : vector<8x8x32xf32>
    %cst_8 = arith.constant dense<0.000000e+00> : vector<8x8xf32>
    %12 = vector.multi_reduction <add>, %11, %cst_8 [2] : vector<8x8x32xf32> to vector<8x8xf32>
    %c0_9 = arith.constant 0 : index
    %c0_10 = arith.constant 0 : index
    %13 = vector.load %arg4[%c0_9, %c0_10] : memref<8x1xi32, #tpu.memory_space<vmem>>, vector<8x1xi32>
    %14 = tpu.iota {dimensions = array<i32: 1>} : vector<8x8xi32>
    %15 = vector.broadcast %13 : vector<8x1xi32> to vector<8x8xi32>
    %16 = arith.cmpi slt, %14, %15 : vector<8x8xi32>
    %cst_11 = arith.constant -1.000000e+30 : f32
    %17 = vector.broadcast %cst_11 : f32 to vector<8x8xf32>
    %18 = arith.select %16, %12, %17 : vector<8x8xi1>, vector<8x8xf32>
    %cst_12 = arith.constant dense<0xFF800000> : vector<8xf32>
    %19 = vector.multi_reduction <maximumf>, %18, %cst_12 [1] : vector<8x8xf32> to vector<8xf32>
    %20 = vector.shape_cast %19 : vector<8xf32> to vector<8x1xf32>
    %21 = vector.broadcast %20 : vector<8x1xf32> to vector<8x8xf32>
    %22 = arith.subf %18, %21 : vector<8x8xf32>
    %23 = math.exp %22 : vector<8x8xf32>
    %cst_13 = arith.constant dense<0.000000e+00> : vector<8xf32>
    %24 = vector.multi_reduction <add>, %23, %cst_13 [1] : vector<8x8xf32> to vector<8xf32>
    %25 = vector.shape_cast %24 : vector<8xf32> to vector<8x1xf32>
    %26 = tpu.reciprocal %25 {approx = true} : vector<8x1xf32> -> vector<8x1xf32>
    %27 = vector.broadcast %26 : vector<8x1xf32> to vector<8x8xf32>
    %28 = arith.mulf %23, %27 : vector<8x8xf32>
    %c0_14 = arith.constant 0 : index
    %c0_15 = arith.constant 0 : index
    %29 = vector.load %arg8[%c0_14, %c0_15] : memref<8x8xf32, #tpu.memory_space<vmem>>, vector<8x8xf32>
    tpu.vector_store %arg8[%c0_14, %c0_15], %28 {strides = array<i32>} : memref<8x8xf32, #tpu.memory_space<vmem>>, vector<8x8xf32>,
    %c0_16 = arith.constant 0 : index
    %c0_17 = arith.constant 0 : index
    %c0_18 = arith.constant 0 : index
    %30 = vector.load %arg3[%c0_16, %c0_17, %c0_18] : memref<8x8x64xf32, #tpu.memory_space<vmem>>, vector<8x8x64xf32>
    %31 = vector.shape_cast %28 : vector<8x8xf32> to vector<8x8x1xf32>
    %32 = vector.broadcast %31 : vector<8x8x1xf32> to vector<8x8x64xf32>
    %33 = arith.mulf %32, %30 : vector<8x8x64xf32>
    %cst_19 = arith.constant dense<0.000000e+00> : vector<8x64xf32>
    %34 = vector.multi_reduction <add>, %33, %cst_19 [1] : vector<8x8x64xf32> to vector<8x64xf32>
    %c0_20 = arith.constant 0 : index
    %c0_21 = arith.constant 0 : index
    %35 = vector.load %arg7[%c0_20, %c0_21] : memref<8x64xf32, #tpu.memory_space<vmem>>, vector<8x64xf32>
    tpu.vector_store %arg7[%c0_20, %c0_21], %34 {strides = array<i32>} : memref<8x64xf32, #tpu.memory_space<vmem>>, vector<8x64xf32>,
    return
  }
  func.func @transform_0(%arg0: i32) -> (i32, i32) {
    %c0_i32 = arith.constant 0 : i32
    %c0_i32_0 = arith.constant 0 : i32
    return %arg0, %c0_i32 : i32, i32
  }
  func.func @transform_1(%arg0: i32) -> (i32, i32, i32) {
    %c0_i32 = arith.constant 0 : i32
    %c0_i32_0 = arith.constant 0 : i32
    %c0_i32_1 = arith.constant 0 : i32
    return %arg0, %c0_i32, %c0_i32_0 : i32, i32, i32
  }
  func.func @transform_2(%arg0: i32) -> (i32, i32, i32) {
    %c0_i32 = arith.constant 0 : i32
    %c0_i32_0 = arith.constant 0 : i32
    %c0_i32_1 = arith.constant 0 : i32
    return %arg0, %c0_i32, %c0_i32_0 : i32, i32, i32
  }
  func.func @transform_3(%arg0: i32) -> (i32, i32) {
    %c0_i32 = arith.constant 0 : i32
    %c0_i32_0 = arith.constant 0 : i32
    return %arg0, %c0_i32 : i32, i32
  }
  func.func @transform_4(%arg0: i32) -> (i32, i32) {
    %c0_i32 = arith.constant 0 : i32
    %c0_i32_0 = arith.constant 0 : i32
    %c0_i32_1 = arith.constant 0 : i32
    return %c0_i32, %c0_i32_0 : i32, i32
  }
  func.func @transform_5(%arg0: i32) -> (i32, i32) {
    %c0_i32 = arith.constant 0 : i32
    %c0_i32_0 = arith.constant 0 : i32
    %c0_i32_1 = arith.constant 0 : i32
    return %c0_i32, %c0_i32_0 : i32, i32
  }
  func.func @transform_6(%arg0: i32) -> (i32, i32) {
    %c0_i32 = arith.constant 0 : i32
    %c0_i32_0 = arith.constant 0 : i32
    return %arg0, %c0_i32 : i32, i32
  }
  func.func @transform_7(%arg0: i32) -> (i32, i32) {
    %c0_i32 = arith.constant 0 : i32
    %c0_i32_0 = arith.constant 0 : i32
    return %arg0, %c0_i32 : i32, i32
  }
}

module attributes {stable_mosaic.version = 11 : i64} {
  func.func @bahdanau_kernel(%arg0: i32, %arg1: memref<8x32xf32, #tpu.memory_space<vmem>>, %arg2: memref<8x8x32xf32, #tpu.memory_space<vmem>>, %arg3: memref<8x8x64xf32, #tpu.memory_space<vmem>>, %arg4: memref<8x1xi32, #tpu.memory_space<vmem>>, %arg5: memref<32x32xf32, #tpu.memory_space<vmem>>, %arg6: memref<1x32xf32, #tpu.memory_space<vmem>>, %arg7: memref<8x64xf32, #tpu.memory_space<vmem>>, %arg8: memref<8x8xf32, #tpu.memory_space<vmem>>) attributes {dimension_semantics = [#tpu.dimension_semantics<parallel>], iteration_bounds = array<i64: 1>, scalar_prefetch = 0 : i64, scratch_operands = 0 : i64, tpu.core_type = #tpu.core_type<tc>, window_params = [{transform_indices = @transform_0, window_bounds = array<i64: 8, 32>}, {transform_indices = @transform_1, window_bounds = array<i64: 8, 8, 32>}, {transform_indices = @transform_2, window_bounds = array<i64: 8, 8, 64>}, {transform_indices = @transform_3, window_bounds = array<i64: 8, 1>}, {pipeline_mode = #tpu.pipeline_mode<synchronous>, transform_indices = @transform_4, window_bounds = array<i64: 32, 32>}, {pipeline_mode = #tpu.pipeline_mode<synchronous>, transform_indices = @transform_5, window_bounds = array<i64: 1, 32>}, {transform_indices = @transform_6, window_bounds = array<i64: 8, 64>}, {transform_indices = @transform_7, window_bounds = array<i64: 8, 8>}]} {
    %c0 = arith.constant 0 : index
    %c0_0 = arith.constant 0 : index
    %0 = vector.load %arg1[%c0, %c0_0] : memref<8x32xf32, #tpu.memory_space<vmem>>, vector<8x32xf32>
    %c0_1 = arith.constant 0 : index
    %c0_2 = arith.constant 0 : index
    %1 = vector.load %arg5[%c0_1, %c0_2] : memref<32x32xf32, #tpu.memory_space<vmem>>, vector<32x32xf32>
    %cst = arith.constant dense<0.000000e+00> : vector<8x32xf32>
    %2 = tpu.matmul %0, %1, %cst {dimension_numbers = #tpu.dot_dimension_numbers<[1], [0], [0], [1], [0, 0, 1, 1], [], []>} : vector<8x32xf32>, vector<32x32xf32>, vector<8x32xf32> -> vector<8x32xf32>
    %c0_3 = arith.constant 0 : index
    %c0_4 = arith.constant 0 : index
    %c0_5 = arith.constant 0 : index
    %3 = vector.load %arg2[%c0_3, %c0_4, %c0_5] : memref<8x8x32xf32, #tpu.memory_space<vmem>>, vector<8x8x32xf32>
    %4 = vector.shape_cast %2 : vector<8x32xf32> to vector<8x1x32xf32>
    %5 = vector.broadcast %4 : vector<8x1x32xf32> to vector<8x8x32xf32>
    %6 = arith.addf %5, %3 : vector<8x8x32xf32>
    %7 = math.tanh %6 : vector<8x8x32xf32>
    %c0_6 = arith.constant 0 : index
    %c0_7 = arith.constant 0 : index
    %8 = vector.load %arg6[%c0_6, %c0_7] : memref<1x32xf32, #tpu.memory_space<vmem>>, vector<1x32xf32>
    %9 = vector.shape_cast %8 : vector<1x32xf32> to vector<1x1x32xf32>
    %10 = vector.broadcast %9 : vector<1x1x32xf32> to vector<8x8x32xf32>
    %11 = arith.mulf %7, %10 : vector<8x8x32xf32>
    %cst_8 = arith.constant dense<0.000000e+00> : vector<8x8xf32>
    %12 = vector.multi_reduction <add>, %11, %cst_8 [2] : vector<8x8x32xf32> to vector<8x8xf32>
    %c0_9 = arith.constant 0 : index
    %c0_10 = arith.constant 0 : index
    %13 = vector.load %arg4[%c0_9, %c0_10] : memref<8x1xi32, #tpu.memory_space<vmem>>, vector<8x1xi32>
    %14 = tpu.iota {dimensions = array<i32: 1>} : vector<8x8xi32>
    %15 = vector.broadcast %13 : vector<8x1xi32> to vector<8x8xi32>
    %16 = arith.cmpi slt, %14, %15 : vector<8x8xi32>
    %cst_11 = arith.constant -1.000000e+30 : f32
    %17 = vector.broadcast %cst_11 : f32 to vector<8x8xf32>
    %18 = arith.select %16, %12, %17 : vector<8x8xi1>, vector<8x8xf32>
    %cst_12 = arith.constant dense<0xFF800000> : vector<8xf32>
    %19 = vector.multi_reduction <maximumf>, %18, %cst_12 [1] : vector<8x8xf32> to vector<8xf32>
    %20 = vector.shape_cast %19 : vector<8xf32> to vector<8x1xf32>
    %21 = vector.broadcast %20 : vector<8x1xf32> to vector<8x8xf32>
    %22 = arith.subf %18, %21 : vector<8x8xf32>
    %23 = math.exp %22 : vector<8x8xf32>
    %cst_13 = arith.constant dense<0.000000e+00> : vector<8xf32>
    %24 = vector.multi_reduction <add>, %23, %cst_13 [1] : vector<8x8xf32> to vector<8xf32>
    %25 = vector.shape_cast %24 : vector<8xf32> to vector<8x1xf32>
    %26 = tpu.reciprocal %25 {approx = true} : vector<8x1xf32> -> vector<8x1xf32>
    %27 = vector.broadcast %26 : vector<8x1xf32> to vector<8x8xf32>
    %28 = arith.mulf %23, %27 : vector<8x8xf32>
    %c0_14 = arith.constant 0 : index
    %c0_15 = arith.constant 0 : index
    %29 = vector.load %arg8[%c0_14, %c0_15] : memref<8x8xf32, #tpu.memory_space<vmem>>, vector<8x8xf32>
    tpu.vector_store %arg8[%c0_14, %c0_15], %28 {strides = array<i32>} : memref<8x8xf32, #tpu.memory_space<vmem>>, vector<8x8xf32>,
    %c0_16 = arith.constant 0 : index
    %c0_17 = arith.constant 0 : index
    %c0_18 = arith.constant 0 : index
    %30 = vector.load %arg3[%c0_16, %c0_17, %c0_18] : memref<8x8x64xf32, #tpu.memory_space<vmem>>, vector<8x8x64xf32>
    %31 = vector.shape_cast %28 : vector<8x8xf32> to vector<8x8x1xf32>
    %32 = vector.broadcast %31 : vector<8x8x1xf32> to vector<8x8x64xf32>
    %33 = arith.mulf %32, %30 : vector<8x8x64xf32>
    %cst_19 = arith.constant dense<0.000000e+00> : vector<8x64xf32>
    %34 = vector.multi_reduction <add>, %33, %cst_19 [1] : vector<8x8x64xf32> to vector<8x64xf32>
    %c0_20 = arith.constant 0 : index
    %c0_21 = arith.constant 0 : index
    %35 = vector.load %arg7[%c0_20, %c0_21] : memref<8x64xf32, #tpu.memory_space<vmem>>, vector<8x64xf32>
    tpu.vector_store %arg7[%c0_20, %c0_21], %34 {strides = array<i32>} : memref<8x64xf32, #tpu.memory_space<vmem>>, vector<8x64xf32>,
    return
  }
  func.func @transform_0(%arg0: i32) -> (i32, i32) {
    %c0_i32 = arith.constant 0 : i32
    %c0_i32_0 = arith.constant 0 : i32
    return %arg0, %c0_i32 : i32, i32
  }
  func.func @transform_1(%arg0: i32) -> (i32, i32, i32) {
    %c0_i32 = arith.constant 0 : i32
    %c0_i32_0 = arith.constant 0 : i32
    %c0_i32_1 = arith.constant 0 : i32
    return %arg0, %c0_i32, %c0_i32_0 : i32, i32, i32
  }
  func.func @transform_2(%arg0: i32) -> (i32, i32, i32) {
    %c0_i32 = arith.constant 0 : i32
    %c0_i32_0 = arith.constant 0 : i32
    %c0_i32_1 = arith.constant 0 : i32
    return %arg0, %c0_i32, %c0_i32_0 : i32, i32, i32
  }
  func.func @transform_3(%arg0: i32) -> (i32, i32) {
    %c0_i32 = arith.constant 0 : i32
    %c0_i32_0 = arith.constant 0 : i32
    return %arg0, %c0_i32 : i32, i32
  }
  func.func @transform_4(%arg0: i32) -> (i32, i32) {
    %c0_i32 = arith.constant 0 : i32
    %c0_i32_0 = arith.constant 0 : i32
    %c0_i32_1 = arith.constant 0 : i32
    return %c0_i32, %c0_i32_0 : i32, i32
  }
  func.func @transform_5(%arg0: i32) -> (i32, i32) {
    %c0_i32 = arith.constant 0 : i32
    %c0_i32_0 = arith.constant 0 : i32
    %c0_i32_1 = arith.constant 0 : i32
    return %c0_i32, %c0_i32_0 : i32, i32
  }
  func.func @transform_6(%arg0: i32) -> (i32, i32) {
    %c0_i32 = arith.constant 0 : i32
    %c0_i32_0 = arith.constant 0 : i32
    return %arg0, %c0_i32 : i32, i32
  }
  func.func @transform_7(%arg0: i32) -> (i32, i32) {
    %c0_i32 = arith.constant 0 : i32
    %c0_i32_0 = arith.constant 0 : i32
    return %arg0, %c0_i32 : i32, i32
  }
}

</mosaic_0001>

<bundles_post_ra>
// kernel: tpu_custom_call.1
= control target key start
LH: loop header
LB: loop body
LE: loop exit
PB: predicated region body
PF: predicated region fallthrough
CT: control target
= control target key end

     0   :  { %13 = vsyncpa [#allocation3], 0  ;;  %s688_s0 = inlined_call_operand.vmem [shape: f32[8,32], index: 0, kind: input, shape index: {}]   ;;  %s689_s1 = inlined_call_operand.hbm [shape: f32[8,8,32], index: 1, kind: input, shape index: {}]   ;;  %s690_s2 = inlined_call_operand.hbm [shape: f32[8,8,64], index: 2, kind: input, shape index: {}]   ;;  %s691_s3 = inlined_call_operand.vmem [shape: s32[8,1], index: 3, kind: input, shape index: {}]   ;;  %s692_s4 = inlined_call_operand.hbm [shape: f32[32,32], index: 4, kind: input, shape index: {}]   ;;  %s693_s5 = inlined_call_operand.vmem [shape: f32[1,32], index: 5, kind: input, shape index: {}]   ;;  %s694_s6 = inlined_call_operand.hbm [shape: f32[8,64], index: 6, kind: output, shape index: {0}]   ;;  %s695_s7 = inlined_call_operand.hbm [shape: f32[8,8], index: 7, kind: output, shape index: {1}]  }
   0x1   :  { %14 = vsyncpa [#allocation6], 0 }
   0x2   :  { %15 = vsyncpa [#allocation4], 0 }
   0x3   :  { %16 = vsyncpa [#allocation10], 0  ;;  %s36_s26 = sshll.u32 %s690_s2, 4  ;;  %s581_s27 = smov [#allocation5]   ;;  %s37_s26 = int_to_ptr.hbm [resolvable:$true] %s36_s26 }
   0x4   :  { %s38_s28 = sshll.u32 %s581_s27, 4  ;;  %s23_s8 = sshll.u32 %s689_s1, 4  ;;  %s39_s28 = int_to_ptr.vmem [resolvable:$true] %s38_s28  ;;  %s24_s8 = int_to_ptr.hbm [resolvable:$true] %s23_s8 }
   0x5   :  { %s582_s9 = smov 128   ;;  %s583_s10 = smov 8  }
   0x6   :  { %44 = dma.hbm_to_vmem [thread:$0]  %s37_s26, 1024, %s39_s28, [#allocation6], %s582_s9, %s582_s9, %s583_s10  }
   0x7   :  { %s584_s11 = smov [#allocation2]   ;;  %s51_s15 = sshll.u32 %s692_s4, 4  ;;  %s52_s15 = int_to_ptr.hbm [resolvable:$true] %s51_s15 }
   0x8   :  { %s25_s12 = sshll.u32 %s584_s11, 4  ;;  %s585_s2 = smov [#allocation7]   ;;  %s26_s12 = int_to_ptr.vmem [resolvable:$true] %s25_s12 }
   0x9   :  { %31 = dma.hbm_to_vmem [thread:$0]  %s24_s8, 1024, %s26_s12, [#allocation3], %s582_s9, %s582_s9, %s583_s10  }
   0xa   :  { %s53_s16 = sshll.u32 %s585_s2, 4  ;;  %s54_s16 = int_to_ptr.vmem [resolvable:$true] %s53_s16 }
   0xb   :  { %59 = dma.hbm_to_vmem [thread:$0]  %s52_s15, 512, %s54_s16, [#allocation6], %s582_s9, %s582_s9, %s583_s10  }
   0xc   :  { %573 = dma.done.wait [#allocation3], 1024  }
   0xd   :  { %574 = vsyncadd [#allocation3], 4294966272 }
   0xe   :  { %575 = dma.done.wait [#allocation6], 1536  }
   0xf   :  { %576 = vsyncadd [#allocation6], 4294965760  ;;  %v78_v0 = vld [vmem:[#allocation7 + $0x18] sm:$0xff]  ;;  %v77_v1 = vld [vmem:[#allocation7 + $0x10] sm:$0xff]  ;;  %vm79_vm0 = vcmask 261120   ;;  %v586_v32 = vmov 0  }
  0x10   :  { %95 = vmatpush.msra.mxu0 %v78_v0  ;;  %v76_v2 = vld [vmem:[#allocation7 + $0x8] sm:$0xff]  ;;  %v75_v3 = vld [vmem:[#allocation7] sm:$0xff]  ;;  %v105_v12 = vld [vmem:[#allocation2 + $0x10] sm:$0xff]  ;;  %428 = vset.pattern.permute.xlu2 %v586_v32  ;;  %vm210_vm1 = vcmask 1041409   ;;  %vm212_vm2 = vcmask 1042434   ;;  %vm214_vm3 = vcmask 1043459  }
  0x11   :  { %v74_v4 = vld [vmem:[%s688_s0] sm:$0xff]  ;;  %v104_v13 = vld [vmem:[#allocation2 + $0x8] sm:$0xff]  ;;  %v106_v27 = vld [vmem:[#allocation2 + $0x18] sm:$0xff]  ;;  %vm216_vm4 = vcmask 1044484   ;;  %vm218_vm5 = vcmask 1045509   ;;  %vm220_vm6 = vcmask 1046534  }
  0x12   :  { %96 = vmatpush.msra.mxu0 %v77_v1  ;;  %v103_v6 = vld [vmem:[#allocation2] sm:$0xff]  ;;  %v108_v20 = vld [vmem:[#allocation2 + $0x28] sm:$0xff]  ;;  %v109_v34 = vld [vmem:[#allocation2 + $0x30] sm:$0xff]  ;;  %v188_v1 = vlaneseq  ;;  %vm222_vm7 = vcmask 1047559   ;;  %vm226_vm9 = vcmask 64512   ;;  %s403_s22 = sshll.u32 %s695_s7, 4  ;;  %s404_s22 = int_to_ptr.hbm [resolvable:$true] %s403_s22 }
  0x13   :  { %v107_v11 = vld [vmem:[#allocation2 + $0x20] sm:$0xff]  ;;  %v110_v40 = vld [vmem:[#allocation2 + $0x38] sm:$0xff]  ;;  %vm311_vm10 = vcmask 523264   ;;  %s588_s7 = smov [#allocation8]   ;;  %s392_s26 = sshll.u32 %s694_s6, 4  ;;  %s393_s26 = int_to_ptr.hbm [resolvable:$true] %s392_s26 }
  0x14   :  { %97 = vmatpush.msra.mxu0 %v76_v2  ;;  %v432_v29 = vld [vmem:[%s693_s5] ss:$0 sm:$0xff]  ;;  %s390_s23 = sshll.u32 %s588_s7, 4  ;;  %s391_s23 = int_to_ptr.vmem [resolvable:$true] %s390_s23 }
  0x15   :  { %v187_v63 = vld [vmem:[%s691_s3] sm:$0xff]  ;;  %s587_s3 = smov [#allocation9]  }
  0x16   :  { %98 = vmatpush.msra.mxu0 %v75_v3  ;;  %s401_s19 = sshll.u32 %s587_s3, 4  ;;  %s402_s19 = int_to_ptr.vmem [resolvable:$true] %s401_s19 }
  0x17   :  { %419 = vmatmul.msk.f32.vlgmr.msra.gmra.mxu0 %vm79_vm0, %v74_v4  ;;  %v189_v4 = vand.u32 127, %v188_v1 }
  0x94   :  { %v100_v5 = vpop.f32.mrf.mxu0 }
  0x95   :  { %v119_v7 = vperm.slane %v100_v5, 0  ;;  %v115_v8 = vrot.slane %v100_v5, 4  ;;  %v113_v9 = vrot.slane %v100_v5, 2  ;;  %v112_v10 = vrot.slane %v100_v5, 1 }
  0x96   :  { %v116_v14 = vrot.slane %v100_v5, 5  ;;  %v114_v15 = vrot.slane %v100_v5, 3  ;;  %v117_v23 = vrot.slane %v100_v5, 6  ;;  %v118_v31 = vrot.slane %v100_v5, 7 }
  0x97   :  { %v135_v16 = vadd.f32 %v119_v7, %v103_v6  ;;  %v123_v17 = vperm.slane %v115_v8, 0  ;;  %v121_v18 = vperm.slane %v113_v9, 0  ;;  %v120_v19 = vperm.slane %v112_v10, 0 }
  0x98   :  { %v124_v21 = vperm.slane %v116_v14, 0  ;;  %v122_v22 = vperm.slane %v114_v15, 0  ;;  %v125_v33 = vperm.slane %v117_v23, 0  ;;  %v126_v37 = vperm.slane %v118_v31, 0 }
  0x99   :  { %433 = vtanh.f32 %v135_v16  ;;  %v139_v24 = vadd.f32 %v123_v17, %v107_v11  ;;  %v137_v25 = vadd.f32 %v121_v18, %v105_v12  ;;  %v136_v26 = vadd.f32 %v120_v19, %v104_v13 }
  0x9a   :  { %v140_v28 = vadd.f32 %v124_v21, %v108_v20  ;;  %v138_v30 = vadd.f32 %v122_v22, %v106_v27  ;;  %v141_v39 = vadd.f32 %v125_v33, %v109_v34  ;;  %v142_v47 = vadd.f32 %v126_v37, %v110_v40 }
  0x9b   :  { %435 = vtanh.f32 %v139_v24  ;;  %v249_v33 = vshrl.u32 %v188_v1, 7 }
  0x9c   :  { %437 = vtanh.f32 %v137_v25 }
  0x9d   :  { %439 = vtanh.f32 %v136_v26  ;;  %430 = vset.pattern.permute.xlu1 %v249_v33  ;;  %429 = vset.pattern.permute.xlu0 %v249_v33 }
  0x9e   :  { %441 = vtanh.f32 %v140_v28 }
  0x9f   :  { %v434_v35 = vpop.eup %433  ;;  %443 = vtanh.f32 %v138_v30 }
  0xa0   :  { %v155_v36 = vmul.f32 %v434_v35, %v432_v29  ;;  %445 = vtanh.f32 %v141_v39 }
  0xa1   :  { %v436_v38 = vpop.eup %435  ;;  %447 = vtanh.f32 %v142_v47  ;;  %v241_v47 = vld [vmem:[#allocation5 + $0x10] sm:$0xff] }
  0xa2   :  { %v438_v41 = vpop.eup %437  ;;  %v163_v42 = vsel %vm79_vm0, %v155_v36, 0.0  ;;  %v159_v43 = vmul.f32 %v436_v38, %v432_v29 }
  0xa3   :  { %v440_v44 = vpop.eup %439  ;;  %164 = vadd.xlane.f32.xlu0 %v163_v42  ;;  %v157_v45 = vmul.f32 %v438_v41, %v432_v29 }
  0xa4   :  { %v175_v46 = vsel %vm79_vm0, %v159_v43, 0.0  ;;  %v442_v48 = vpop.eup %441  ;;  %v156_v51 = vmul.f32 %v440_v44, %v432_v29 }
  0xa5   :  { %176 = vadd.xlane.f32.xlu2 %v175_v46  ;;  %v169_v49 = vsel %vm79_vm0, %v157_v45, 0.0  ;;  %v444_v50 = vpop.eup %443  ;;  %v160_v52 = vmul.f32 %v442_v48, %v432_v29 }
  0xa6   :  { %170 = vadd.xlane.f32.xlu1 %v169_v49  ;;  %v158_v53 = vmul.f32 %v444_v50, %v432_v29  ;;  %v166_v54 = vsel %vm79_vm0, %v156_v51, 0.0  ;;  %v446_v55 = vpop.eup %445  ;;  %v242_v49 = vld [vmem:[#allocation5 + $0x18] sm:$0xff] }
  0xa7   :  { %v178_v56 = vsel %vm79_vm0, %v160_v52, 0.0  ;;  %v448_v58 = vpop.eup %447  ;;  %v161_v59 = vmul.f32 %v446_v55, %v432_v29  ;;  %v243_v52 = vld [vmem:[#allocation5 + $0x20] sm:$0xff]  ;;  %v240_v55 = vld [vmem:[#allocation5 + $0x8] sm:$0xff] }
  0xa8   :  { %v172_v57 = vsel %vm79_vm0, %v158_v53, 0.0  ;;  %v162_v60 = vmul.f32 %v448_v58, %v432_v29  ;;  %v245_v58 = vld [vmem:[#allocation5 + $0x30] sm:$0xff] }
  0xa9   :  { %v181_v61 = vsel %vm79_vm0, %v161_v59, 0.0  ;;  %v239_v59 = vld [vmem:[#allocation5] sm:$0xff] }
  0xaa   :  { %v184_v62 = vsel %vm79_vm0, %v162_v60, 0.0 }
  0xab   :  { %167 = vadd.xlane.f32.xlu0 %v166_v54 }
  0xad   :  { %179 = vadd.xlane.f32.xlu2 %v178_v56 }
  0xae   :  { %173 = vadd.xlane.f32.xlu1 %v172_v57 }
  0xb3   :  { %182 = vadd.xlane.f32.xlu0 %v181_v61 }
  0xb6   :  { %185 = vadd.xlane.f32.xlu1 %v184_v62 }
  0xc5   :  { %191 = vperm.xlu2 %428, %v187_v63  }
  0xcd   :  { %431 = vset.pattern.permute.xlu2 %v249_v33 }
 0x116   :  { %v165_v0 = vpop.xlane.xlu0 %164 }
 0x117   :  { %v202_v6 = vperm.slane %v165_v0, %v189_v4 }
 0x118   :  { %v177_v2 = vpop.xlane.xlu2 %176 }
 0x119   :  { %v171_v3 = vpop.xlane.xlu1 %170  ;;  %v206_v14 = vperm.slane %v177_v2, %v189_v4 }
 0x11a   :  { %v204_v8 = vperm.slane %v171_v3, %v189_v4 }
 0x11e   :  { %v168_v5 = vpop.xlane.xlu0 %167 }
 0x11f   :  { %v203_v7 = vperm.slane %v168_v5, %v189_v4 }
 0x120   :  { %v180_v9 = vpop.xlane.xlu2 %179 }
 0x121   :  { %v211_v10 = vsel %vm210_vm1, %v203_v7, %v202_v6  ;;  %v174_v11 = vpop.xlane.xlu1 %173  ;;  %v207_v17 = vperm.slane %v180_v9, %v189_v4 }
 0x122   :  { %v205_v12 = vperm.slane %v174_v11, %v189_v4  ;;  %v213_v13 = vsel %vm212_vm2, %v204_v8, %v211_v10 }
 0x124   :  { %v215_v15 = vsel %vm214_vm3, %v205_v12, %v213_v13  ;;  %v244_v13 = vld [vmem:[#allocation5 + $0x28] sm:$0xff] }
 0x125   :  { %v217_v16 = vsel %vm216_vm4, %v206_v14, %v215_v15 }
 0x126   :  { %v183_v18 = vpop.xlane.xlu0 %182  ;;  %v219_v21 = vsel %vm218_vm5, %v207_v17, %v217_v16 }
 0x127   :  { %v208_v19 = vperm.slane %v183_v18, %v189_v4 }
 0x128   :  { %v192_v20 = vpop.permute.xlu2 %191 }
 0x129   :  { %v186_v22 = vpop.xlane.xlu1 %185  ;;  %v221_v23 = vsel %vm220_vm6, %v208_v19, %v219_v21  ;;  %vm193_vm8 = vcmp.lt.s32.totalorder %v189_v4, %v192_v20 }
 0x12a   :  { %v209_v24 = vperm.slane %v186_v22, %v189_v4 }
 0x12c   :  { %v223_v25 = vsel %vm222_vm7, %v209_v24, %v221_v23 }
 0x12d   :  { %v225_v26 = vsel %vm193_vm8, %v223_v25, -1e+30 }
 0x12e   :  { %v227_v27 = vsel %vm226_vm9, %v225_v26, -inf }
 0x12f   :  { %228 = vmax.xlane.f32.xlu0 %v227_v27 }
 0x1a2   :  { %v229_v28 = vpop.xlane.xlu0 %228 }
 0x1a3   :  { %v230_v29 = vsub.f32 %v225_v26, %v229_v28 }
 0x1a5   :  { %v231_v30 = vmul.f32 1.442695, %v230_v29 }
 0x1a7   :  { %449 = vpow2.f32 %v231_v30 }
 0x1ad   :  { %v450_v31 = vpop.eup %449 }
 0x1ae   :  { %v233_v32 = vsel %vm226_vm9, %v450_v31, 0.0 }
 0x1af   :  { %234 = vadd.xlane.f32.xlu1 %v233_v32 }
 0x222   :  { %v235_v34 = vpop.xlane.xlu1 %234 }
 0x223   :  { %451 = vrcp.f32 %v235_v34 }
 0x229   :  { %v452_v35 = vpop.eup %451 }
 0x22a   :  { %v237_v36 = vmul.f32 %v452_v35, %v450_v31  ;;  %v246_v35 = vld [vmem:[#allocation5 + $0x38] sm:$0xff] }
 0x22c   :  { %238 = vst.msk [vmem:[#allocation9] sm:$0xff] %vm226_vm9, %v237_v36  ;;  %v261_v37 = vperm.slane %v237_v36, 2  ;;  %v254_v38 = vperm.slane %v237_v36, 1  ;;  %v247_v39 = vperm.slane %v237_v36, 0  ;;  %v268_v40 = vperm.slane %v237_v36, 3 }
 0x22d   :  { %v282_v41 = vperm.slane %v237_v36, 5  ;;  %v275_v42 = vperm.slane %v237_v36, 4  ;;  %v296_v43 = vperm.slane %v237_v36, 7  ;;  %v289_v44 = vperm.slane %v237_v36, 6  ;;  %406 = dma.vmem_to_hbm [thread:$0]  %s402_s19, 128, %s404_s22, [#allocation10]  }
 0x22e   :  { %266 = vperm.xlu2 %431, %v261_v37   ;;  %259 = vperm.xlu1 %430, %v254_v38  }
 0x22f   :  { %252 = vperm.xlu0 %429, %v247_v39  }
 0x236   :  { %273 = vperm.xlu2 %431, %v268_v40   ;;  %287 = vperm.xlu1 %430, %v282_v41  }
 0x23e   :  { %280 = vperm.xlu2 %431, %v275_v42   ;;  %301 = vperm.xlu1 %430, %v296_v43  }
 0x246   :  { %294 = vperm.xlu2 %431, %v289_v44  }
 0x288   :  { %v267_v45 = vpop.permute.xlu2 %266 }
 0x289   :  { %v305_v48 = vmul.f32 %v267_v45, %v241_v47 }
 0x28b   :  { %v326_v53 = vsel %vm311_vm10, %v305_v48, 0.0 }
 0x28c   :  { %v327_v56 = vrot.slane %v326_v53, 4 }
 0x28e   :  { %v328_v4 = vadd.f32 %v327_v56, %v326_v53 }
 0x290   :  { %v274_v46 = vpop.permute.xlu2 %273  ;;  %v329_v14 = vrot.slane %v328_v4, 2 }
 0x291   :  { %v306_v51 = vmul.f32 %v274_v46, %v242_v49 }
 0x292   :  { %v330_v24 = vadd.f32 %v329_v14, %v328_v4 }
 0x293   :  { %v333_v57 = vsel %vm311_vm10, %v306_v51, 0.0 }
 0x294   :  { %v334_v0 = vrot.slane %v333_v57, 4  ;;  %v331_v36 = vrot.slane %v330_v24, 1 }
 0x296   :  { %v335_v10 = vadd.f32 %v334_v0, %v333_v57  ;;  %v332_v46 = vadd.f32 %v331_v36, %v330_v24 }
 0x298   :  { %v281_v50 = vpop.permute.xlu2 %280  ;;  %v336_v22 = vrot.slane %v335_v10, 2 }
 0x299   :  { %v307_v54 = vmul.f32 %v281_v50, %v243_v52 }
 0x29a   :  { %v337_v32 = vadd.f32 %v336_v22, %v335_v10 }
 0x29b   :  { %v340_v1 = vsel %vm311_vm10, %v307_v54, 0.0 }
 0x29c   :  { %v341_v8 = vrot.slane %v340_v1, 4  ;;  %v338_v43 = vrot.slane %v337_v32, 1 }
 0x29e   :  { %v342_v18 = vadd.f32 %v341_v8, %v340_v1  ;;  %v339_v53 = vadd.f32 %v338_v43, %v337_v32 }
 0x2a0   :  { %v295_v60 = vpop.permute.xlu2 %294  ;;  %v260_v61 = vpop.permute.xlu1 %259  ;;  %v343_v29 = vrot.slane %v342_v18, 2 }
 0x2a1   :  { %v304_v62 = vmul.f32 %v260_v61, %v240_v55  ;;  %v253_v63 = vpop.permute.xlu0 %252  ;;  %v309_v2 = vmul.f32 %v295_v60, %v245_v58 }
 0x2a2   :  { %v303_v3 = vmul.f32 %v253_v63, %v239_v59  ;;  %v344_v40 = vadd.f32 %v343_v29, %v342_v18 }
 0x2a3   :  { %v319_v5 = vsel %vm311_vm10, %v304_v62, 0.0  ;;  %v354_v11 = vsel %vm311_vm10, %v309_v2, 0.0 }
 0x2a4   :  { %v320_v6 = vrot.slane %v319_v5, 4  ;;  %v312_v7 = vsel %vm311_vm10, %v303_v3, 0.0  ;;  %v355_v19 = vrot.slane %v354_v11, 4  ;;  %v345_v50 = vrot.slane %v344_v40, 1 }
 0x2a5   :  { %v313_v9 = vrot.slane %v312_v7, 4 }
 0x2a6   :  { %v321_v12 = vadd.f32 %v320_v6, %v319_v5  ;;  %v356_v30 = vadd.f32 %v355_v19, %v354_v11  ;;  %v346_v58 = vadd.f32 %v345_v50, %v344_v40 }
 0x2a7   :  { %v314_v15 = vadd.f32 %v313_v9, %v312_v7 }
 0x2a8   :  { %v322_v16 = vrot.slane %v321_v12, 2  ;;  %v288_v17 = vpop.permute.xlu1 %287  ;;  %v357_v41 = vrot.slane %v356_v30, 2 }
 0x2a9   :  { %v315_v20 = vrot.slane %v314_v15, 2  ;;  %v308_v21 = vmul.f32 %v288_v17, %v244_v13 }
 0x2aa   :  { %v323_v23 = vadd.f32 %v322_v16, %v321_v12  ;;  %v358_v51 = vadd.f32 %v357_v41, %v356_v30 }
 0x2ab   :  { %v316_v25 = vadd.f32 %v315_v20, %v314_v15  ;;  %v347_v26 = vsel %vm311_vm10, %v308_v21, 0.0 }
 0x2ac   :  { %v324_v27 = vrot.slane %v323_v23, 1  ;;  %v348_v28 = vrot.slane %v347_v26, 4  ;;  %v359_v59 = vrot.slane %v358_v51, 1 }
 0x2ad   :  { %v317_v31 = vrot.slane %v316_v25, 1 }
 0x2ae   :  { %v325_v33 = vadd.f32 %v324_v27, %v323_v23  ;;  %v349_v34 = vadd.f32 %v348_v28, %v347_v26  ;;  %v360_v0 = vadd.f32 %v359_v59, %v358_v51 }
 0x2af   :  { %v318_v37 = vadd.f32 %v317_v31, %v316_v25 }
 0x2b0   :  { %v350_v38 = vrot.slane %v349_v34, 2  ;;  %v302_v39 = vpop.permute.xlu1 %301 }
 0x2b1   :  { %v310_v42 = vmul.f32 %v302_v39, %v246_v35  ;;  %v376_v44 = vsel %vm210_vm1, %v325_v33, %v318_v37 }
 0x2b2   :  { %v351_v45 = vadd.f32 %v350_v38, %v349_v34  ;;  %v377_v52 = vsel %vm212_vm2, %v332_v46, %v376_v44 }
 0x2b3   :  { %v361_v47 = vsel %vm311_vm10, %v310_v42, 0.0  ;;  %v378_v57 = vsel %vm214_vm3, %v339_v53, %v377_v52 }
 0x2b4   :  { %v352_v48 = vrot.slane %v351_v45, 1  ;;  %v362_v49 = vrot.slane %v361_v47, 4  ;;  %v379_v61 = vsel %vm216_vm4, %v346_v58, %v378_v57 }
 0x2b6   :  { %v363_v54 = vadd.f32 %v362_v49, %v361_v47  ;;  %v353_v55 = vadd.f32 %v352_v48, %v351_v45 }
 0x2b8   :  { %v364_v56 = vrot.slane %v363_v54, 2  ;;  %v380_v63 = vsel %vm218_vm5, %v353_v55, %v379_v61 }
 0x2b9   :  { %v381_v2 = vsel %vm220_vm6, %v360_v0, %v380_v63 }
 0x2ba   :  { %v365_v60 = vadd.f32 %v364_v56, %v363_v54 }
 0x2bc   :  { %v366_v62 = vrot.slane %v365_v60, 1 }
 0x2be   :  { %v367_v1 = vadd.f32 %v366_v62, %v365_v60 }
 0x2c0   :  { %v382_v3 = vsel %vm222_vm7, %v367_v1, %v381_v2 }
 0x2c1   :  { %384 = vst.msk [vmem:[#allocation8] sm:$0xff] %vm311_vm10, %v382_v3 }
 0x2c2   :  { %395 = dma.vmem_to_hbm [thread:$0]  %s391_s23, 128, %s393_s26, [#allocation4]  }
 0x2c3   :  { %577 = dma.done.wait [#allocation4], 128  }
 0x2c4   :  { %578 = vsyncadd [#allocation4], 4294967168 }
 0x2c5   :  { %579 = dma.done.wait [#allocation10], 128  }
 0x2c6   :  { %580 = vsyncadd [#allocation10], 4294967168 }
 0x2c7   :  { %415 = vsyncpa [#allocation3], 1 }
 0x2c8   :  { %416 = vsyncpa [#allocation6], 1 }
 0x2c9   :  { %417 = vsyncpa [#allocation4], 1 }
 0x2ca   :  { %418 = vsyncpa [#allocation10], 1 }

// kernel: tpu_custom_call.1
= control target key start
LH: loop header
LB: loop body
LE: loop exit
PB: predicated region body
PF: predicated region fallthrough
CT: control target
= control target key end

     0   :  { %13 = vsyncpa [#allocation3], 0  ;;  %s688_s0 = inlined_call_operand.vmem [shape: f32[8,32], index: 0, kind: input, shape index: {}]   ;;  %s689_s1 = inlined_call_operand.hbm [shape: f32[8,8,32], index: 1, kind: input, shape index: {}]   ;;  %s690_s2 = inlined_call_operand.hbm [shape: f32[8,8,64], index: 2, kind: input, shape index: {}]   ;;  %s691_s3 = inlined_call_operand.vmem [shape: s32[8,1], index: 3, kind: input, shape index: {}]   ;;  %s692_s4 = inlined_call_operand.hbm [shape: f32[32,32], index: 4, kind: input, shape index: {}]   ;;  %s693_s5 = inlined_call_operand.vmem [shape: f32[1,32], index: 5, kind: input, shape index: {}]   ;;  %s694_s6 = inlined_call_operand.hbm [shape: f32[8,64], index: 6, kind: output, shape index: {0}]   ;;  %s695_s7 = inlined_call_operand.hbm [shape: f32[8,8], index: 7, kind: output, shape index: {1}]  }
   0x1   :  { %14 = vsyncpa [#allocation6], 0 }
   0x2   :  { %15 = vsyncpa [#allocation4], 0 }
   0x3   :  { %16 = vsyncpa [#allocation10], 0  ;;  %s36_s26 = sshll.u32 %s690_s2, 4  ;;  %s581_s27 = smov [#allocation5]   ;;  %s37_s26 = int_to_ptr.hbm [resolvable:$true] %s36_s26 }
   0x4   :  { %s38_s28 = sshll.u32 %s581_s27, 4  ;;  %s23_s8 = sshll.u32 %s689_s1, 4  ;;  %s39_s28 = int_to_ptr.vmem [resolvable:$true] %s38_s28  ;;  %s24_s8 = int_to_ptr.hbm [resolvable:$true] %s23_s8 }
   0x5   :  { %s582_s9 = smov 128   ;;  %s583_s10 = smov 8  }
   0x6   :  { %44 = dma.hbm_to_vmem [thread:$0]  %s37_s26, 1024, %s39_s28, [#allocation6], %s582_s9, %s582_s9, %s583_s10  }
   0x7   :  { %s584_s11 = smov [#allocation2]   ;;  %s51_s15 = sshll.u32 %s692_s4, 4  ;;  %s52_s15 = int_to_ptr.hbm [resolvable:$true] %s51_s15 }
   0x8   :  { %s25_s12 = sshll.u32 %s584_s11, 4  ;;  %s585_s2 = smov [#allocation7]   ;;  %s26_s12 = int_to_ptr.vmem [resolvable:$true] %s25_s12 }
   0x9   :  { %31 = dma.hbm_to_vmem [thread:$0]  %s24_s8, 1024, %s26_s12, [#allocation3], %s582_s9, %s582_s9, %s583_s10  }
   0xa   :  { %s53_s16 = sshll.u32 %s585_s2, 4  ;;  %s54_s16 = int_to_ptr.vmem [resolvable:$true] %s53_s16 }
   0xb   :  { %59 = dma.hbm_to_vmem [thread:$0]  %s52_s15, 512, %s54_s16, [#allocation6], %s582_s9, %s582_s9, %s583_s10  }
   0xc   :  { %573 = dma.done.wait [#allocation3], 1024  }
   0xd   :  { %574 = vsyncadd [#allocation3], 4294966272 }
   0xe   :  { %575 = dma.done.wait [#allocation6], 1536  }
   0xf   :  { %576 = vsyncadd [#allocation6], 4294965760  ;;  %v78_v0 = vld [vmem:[#allocation7 + $0x18] sm:$0xff]  ;;  %v77_v1 = vld [vmem:[#allocation7 + $0x10] sm:$0xff]  ;;  %vm79_vm0 = vcmask 261120   ;;  %v586_v32 = vmov 0  }
  0x10   :  { %95 = vmatpush.msra.mxu0 %v78_v0  ;;  %v76_v2 = vld [vmem:[#allocation7 + $0x8] sm:$0xff]  ;;  %v75_v3 = vld [vmem:[#allocation7] sm:$0xff]  ;;  %v105_v12 = vld [vmem:[#allocation2 + $0x10] sm:$0xff]  ;;  %428 = vset.pattern.permute.xlu2 %v586_v32  ;;  %vm210_vm1 = vcmask 1041409   ;;  %vm212_vm2 = vcmask 1042434   ;;  %vm214_vm3 = vcmask 1043459  }
  0x11   :  { %v74_v4 = vld [vmem:[%s688_s0] sm:$0xff]  ;;  %v104_v13 = vld [vmem:[#allocation2 + $0x8] sm:$0xff]  ;;  %v106_v27 = vld [vmem:[#allocation2 + $0x18] sm:$0xff]  ;;  %vm216_vm4 = vcmask 1044484   ;;  %vm218_vm5 = vcmask 1045509   ;;  %vm220_vm6 = vcmask 1046534  }
  0x12   :  { %96 = vmatpush.msra.mxu0 %v77_v1  ;;  %v103_v6 = vld [vmem:[#allocation2] sm:$0xff]  ;;  %v108_v20 = vld [vmem:[#allocation2 + $0x28] sm:$0xff]  ;;  %v109_v34 = vld [vmem:[#allocation2 + $0x30] sm:$0xff]  ;;  %v188_v1 = vlaneseq  ;;  %vm222_vm7 = vcmask 1047559   ;;  %vm226_vm9 = vcmask 64512   ;;  %s403_s22 = sshll.u32 %s695_s7, 4  ;;  %s404_s22 = int_to_ptr.hbm [resolvable:$true] %s403_s22 }
  0x13   :  { %v107_v11 = vld [vmem:[#allocation2 + $0x20] sm:$0xff]  ;;  %v110_v40 = vld [vmem:[#allocation2 + $0x38] sm:$0xff]  ;;  %vm311_vm10 = vcmask 523264   ;;  %s588_s7 = smov [#allocation8]   ;;  %s392_s26 = sshll.u32 %s694_s6, 4  ;;  %s393_s26 = int_to_ptr.hbm [resolvable:$true] %s392_s26 }
  0x14   :  { %97 = vmatpush.msra.mxu0 %v76_v2  ;;  %v432_v29 = vld [vmem:[%s693_s5] ss:$0 sm:$0xff]  ;;  %s390_s23 = sshll.u32 %s588_s7, 4  ;;  %s391_s23 = int_to_ptr.vmem [resolvable:$true] %s390_s23 }
  0x15   :  { %v187_v63 = vld [vmem:[%s691_s3] sm:$0xff]  ;;  %s587_s3 = smov [#allocation9]  }
  0x16   :  { %98 = vmatpush.msra.mxu0 %v75_v3  ;;  %s401_s19 = sshll.u32 %s587_s3, 4  ;;  %s402_s19 = int_to_ptr.vmem [resolvable:$true] %s401_s19 }
  0x17   :  { %419 = vmatmul.msk.f32.vlgmr.msra.gmra.mxu0 %vm79_vm0, %v74_v4  ;;  %v189_v4 = vand.u32 127, %v188_v1 }
  0x94   :  { %v100_v5 = vpop.f32.mrf.mxu0 }
  0x95   :  { %v119_v7 = vperm.slane %v100_v5, 0  ;;  %v115_v8 = vrot.slane %v100_v5, 4  ;;  %v113_v9 = vrot.slane %v100_v5, 2  ;;  %v112_v10 = vrot.slane %v100_v5, 1 }
  0x96   :  { %v116_v14 = vrot.slane %v100_v5, 5  ;;  %v114_v15 = vrot.slane %v100_v5, 3  ;;  %v117_v23 = vrot.slane %v100_v5, 6  ;;  %v118_v31 = vrot.slane %v100_v5, 7 }
  0x97   :  { %v135_v16 = vadd.f32 %v119_v7, %v103_v6  ;;  %v123_v17 = vperm.slane %v115_v8, 0  ;;  %v121_v18 = vperm.slane %v113_v9, 0  ;;  %v120_v19 = vperm.slane %v112_v10, 0 }
  0x98   :  { %v124_v21 = vperm.slane %v116_v14, 0  ;;  %v122_v22 = vperm.slane %v114_v15, 0  ;;  %v125_v33 = vperm.slane %v117_v23, 0  ;;  %v126_v37 = vperm.slane %v118_v31, 0 }
  0x99   :  { %433 = vtanh.f32 %v135_v16  ;;  %v139_v24 = vadd.f32 %v123_v17, %v107_v11  ;;  %v137_v25 = vadd.f32 %v121_v18, %v105_v12  ;;  %v136_v26 = vadd.f32 %v120_v19, %v104_v13 }
  0x9a   :  { %v140_v28 = vadd.f32 %v124_v21, %v108_v20  ;;  %v138_v30 = vadd.f32 %v122_v22, %v106_v27  ;;  %v141_v39 = vadd.f32 %v125_v33, %v109_v34  ;;  %v142_v47 = vadd.f32 %v126_v37, %v110_v40 }
  0x9b   :  { %435 = vtanh.f32 %v139_v24  ;;  %v249_v33 = vshrl.u32 %v188_v1, 7 }
  0x9c   :  { %437 = vtanh.f32 %v137_v25 }
  0x9d   :  { %439 = vtanh.f32 %v136_v26  ;;  %430 = vset.pattern.permute.xlu1 %v249_v33  ;;  %429 = vset.pattern.permute.xlu0 %v249_v33 }
  0x9e   :  { %441 = vtanh.f32 %v140_v28 }
  0x9f   :  { %v434_v35 = vpop.eup %433  ;;  %443 = vtanh.f32 %v138_v30 }
  0xa0   :  { %v155_v36 = vmul.f32 %v434_v35, %v432_v29  ;;  %445 = vtanh.f32 %v141_v39 }
  0xa1   :  { %v436_v38 = vpop.eup %435  ;;  %447 = vtanh.f32 %v142_v47  ;;  %v241_v47 = vld [vmem:[#allocation5 + $0x10] sm:$0xff] }
  0xa2   :  { %v438_v41 = vpop.eup %437  ;;  %v163_v42 = vsel %vm79_vm0, %v155_v36, 0.0  ;;  %v159_v43 = vmul.f32 %v436_v38, %v432_v29 }
  0xa3   :  { %v440_v44 = vpop.eup %439  ;;  %164 = vadd.xlane.f32.xlu0 %v163_v42  ;;  %v157_v45 = vmul.f32 %v438_v41, %v432_v29 }
  0xa4   :  { %v175_v46 = vsel %vm79_vm0, %v159_v43, 0.0  ;;  %v442_v48 = vpop.eup %441  ;;  %v156_v51 = vmul.f32 %v440_v44, %v432_v29 }
  0xa5   :  { %176 = vadd.xlane.f32.xlu2 %v175_v46  ;;  %v169_v49 = vsel %vm79_vm0, %v157_v45, 0.0  ;;  %v444_v50 = vpop.eup %443  ;;  %v160_v52 = vmul.f32 %v442_v48, %v432_v29 }
  0xa6   :  { %170 = vadd.xlane.f32.xlu1 %v169_v49  ;;  %v158_v53 = vmul.f32 %v444_v50, %v432_v29  ;;  %v166_v54 = vsel %vm79_vm0, %v156_v51, 0.0  ;;  %v446_v55 = vpop.eup %445  ;;  %v242_v49 = vld [vmem:[#allocation5 + $0x18] sm:$0xff] }
  0xa7   :  { %v178_v56 = vsel %vm79_vm0, %v160_v52, 0.0  ;;  %v448_v58 = vpop.eup %447  ;;  %v161_v59 = vmul.f32 %v446_v55, %v432_v29  ;;  %v243_v52 = vld [vmem:[#allocation5 + $0x20] sm:$0xff]  ;;  %v240_v55 = vld [vmem:[#allocation5 + $0x8] sm:$0xff] }
  0xa8   :  { %v172_v57 = vsel %vm79_vm0, %v158_v53, 0.0  ;;  %v162_v60 = vmul.f32 %v448_v58, %v432_v29  ;;  %v245_v58 = vld [vmem:[#allocation5 + $0x30] sm:$0xff] }
  0xa9   :  { %v181_v61 = vsel %vm79_vm0, %v161_v59, 0.0  ;;  %v239_v59 = vld [vmem:[#allocation5] sm:$0xff] }
  0xaa   :  { %v184_v62 = vsel %vm79_vm0, %v162_v60, 0.0 }
  0xab   :  { %167 = vadd.xlane.f32.xlu0 %v166_v54 }
  0xad   :  { %179 = vadd.xlane.f32.xlu2 %v178_v56 }
  0xae   :  { %173 = vadd.xlane.f32.xlu1 %v172_v57 }
  0xb3   :  { %182 = vadd.xlane.f32.xlu0 %v181_v61 }
  0xb6   :  { %185 = vadd.xlane.f32.xlu1 %v184_v62 }
  0xc5   :  { %191 = vperm.xlu2 %428, %v187_v63  }
  0xcd   :  { %431 = vset.pattern.permute.xlu2 %v249_v33 }
 0x116   :  { %v165_v0 = vpop.xlane.xlu0 %164 }
 0x117   :  { %v202_v6 = vperm.slane %v165_v0, %v189_v4 }
 0x118   :  { %v177_v2 = vpop.xlane.xlu2 %176 }
 0x119   :  { %v171_v3 = vpop.xlane.xlu1 %170  ;;  %v206_v14 = vperm.slane %v177_v2, %v189_v4 }
 0x11a   :  { %v204_v8 = vperm.slane %v171_v3, %v189_v4 }
 0x11e   :  { %v168_v5 = vpop.xlane.xlu0 %167 }
 0x11f   :  { %v203_v7 = vperm.slane %v168_v5, %v189_v4 }
 0x120   :  { %v180_v9 = vpop.xlane.xlu2 %179 }
 0x121   :  { %v211_v10 = vsel %vm210_vm1, %v203_v7, %v202_v6  ;;  %v174_v11 = vpop.xlane.xlu1 %173  ;;  %v207_v17 = vperm.slane %v180_v9, %v189_v4 }
 0x122   :  { %v205_v12 = vperm.slane %v174_v11, %v189_v4  ;;  %v213_v13 = vsel %vm212_vm2, %v204_v8, %v211_v10 }
 0x124   :  { %v215_v15 = vsel %vm214_vm3, %v205_v12, %v213_v13  ;;  %v244_v13 = vld [vmem:[#allocation5 + $0x28] sm:$0xff] }
 0x125   :  { %v217_v16 = vsel %vm216_vm4, %v206_v14, %v215_v15 }
 0x126   :  { %v183_v18 = vpop.xlane.xlu0 %182  ;;  %v219_v21 = vsel %vm218_vm5, %v207_v17, %v217_v16 }
 0x127   :  { %v208_v19 = vperm.slane %v183_v18, %v189_v4 }
 0x128   :  { %v192_v20 = vpop.permute.xlu2 %191 }
 0x129   :  { %v186_v22 = vpop.xlane.xlu1 %185  ;;  %v221_v23 = vsel %vm220_vm6, %v208_v19, %v219_v21  ;;  %vm193_vm8 = vcmp.lt.s32.totalorder %v189_v4, %v192_v20 }
 0x12a   :  { %v209_v24 = vperm.slane %v186_v22, %v189_v4 }
 0x12c   :  { %v223_v25 = vsel %vm222_vm7, %v209_v24, %v221_v23 }
 0x12d   :  { %v225_v26 = vsel %vm193_vm8, %v223_v25, -1e+30 }
 0x12e   :  { %v227_v27 = vsel %vm226_vm9, %v225_v26, -inf }
 0x12f   :  { %228 = vmax.xlane.f32.xlu0 %v227_v27 }
 0x1a2   :  { %v229_v28 = vpop.xlane.xlu0 %228 }
 0x1a3   :  { %v230_v29 = vsub.f32 %v225_v26, %v229_v28 }
 0x1a5   :  { %v231_v30 = vmul.f32 1.442695, %v230_v29 }
 0x1a7   :  { %449 = vpow2.f32 %v231_v30 }
 0x1ad   :  { %v450_v31 = vpop.eup %449 }
 0x1ae   :  { %v233_v32 = vsel %vm226_vm9, %v450_v31, 0.0 }
 0x1af   :  { %234 = vadd.xlane.f32.xlu1 %v233_v32 }
 0x222   :  { %v235_v34 = vpop.xlane.xlu1 %234 }
 0x223   :  { %451 = vrcp.f32 %v235_v34 }
 0x229   :  { %v452_v35 = vpop.eup %451 }
 0x22a   :  { %v237_v36 = vmul.f32 %v452_v35, %v450_v31  ;;  %v246_v35 = vld [vmem:[#allocation5 + $0x38] sm:$0xff] }
 0x22c   :  { %238 = vst.msk [vmem:[#allocation9] sm:$0xff] %vm226_vm9, %v237_v36  ;;  %v261_v37 = vperm.slane %v237_v36, 2  ;;  %v254_v38 = vperm.slane %v237_v36, 1  ;;  %v247_v39 = vperm.slane %v237_v36, 0  ;;  %v268_v40 = vperm.slane %v237_v36, 3 }
 0x22d   :  { %v282_v41 = vperm.slane %v237_v36, 5  ;;  %v275_v42 = vperm.slane %v237_v36, 4  ;;  %v296_v43 = vperm.slane %v237_v36, 7  ;;  %v289_v44 = vperm.slane %v237_v36, 6  ;;  %406 = dma.vmem_to_hbm [thread:$0]  %s402_s19, 128, %s404_s22, [#allocation10]  }
 0x22e   :  { %266 = vperm.xlu2 %431, %v261_v37   ;;  %259 = vperm.xlu1 %430, %v254_v38  }
 0x22f   :  { %252 = vperm.xlu0 %429, %v247_v39  }
 0x236   :  { %273 = vperm.xlu2 %431, %v268_v40   ;;  %287 = vperm.xlu1 %430, %v282_v41  }
 0x23e   :  { %280 = vperm.xlu2 %431, %v275_v42   ;;  %301 = vperm.xlu1 %430, %v296_v43  }
 0x246   :  { %294 = vperm.xlu2 %431, %v289_v44  }
 0x288   :  { %v267_v45 = vpop.permute.xlu2 %266 }
 0x289   :  { %v305_v48 = vmul.f32 %v267_v45, %v241_v47 }
 0x28b   :  { %v326_v53 = vsel %vm311_vm10, %v305_v48, 0.0 }
 0x28c   :  { %v327_v56 = vrot.slane %v326_v53, 4 }
 0x28e   :  { %v328_v4 = vadd.f32 %v327_v56, %v326_v53 }
 0x290   :  { %v274_v46 = vpop.permute.xlu2 %273  ;;  %v329_v14 = vrot.slane %v328_v4, 2 }
 0x291   :  { %v306_v51 = vmul.f32 %v274_v46, %v242_v49 }
 0x292   :  { %v330_v24 = vadd.f32 %v329_v14, %v328_v4 }
 0x293   :  { %v333_v57 = vsel %vm311_vm10, %v306_v51, 0.0 }
 0x294   :  { %v334_v0 = vrot.slane %v333_v57, 4  ;;  %v331_v36 = vrot.slane %v330_v24, 1 }
 0x296   :  { %v335_v10 = vadd.f32 %v334_v0, %v333_v57  ;;  %v332_v46 = vadd.f32 %v331_v36, %v330_v24 }
 0x298   :  { %v281_v50 = vpop.permute.xlu2 %280  ;;  %v336_v22 = vrot.slane %v335_v10, 2 }
 0x299   :  { %v307_v54 = vmul.f32 %v281_v50, %v243_v52 }
 0x29a   :  { %v337_v32 = vadd.f32 %v336_v22, %v335_v10 }
 0x29b   :  { %v340_v1 = vsel %vm311_vm10, %v307_v54, 0.0 }
 0x29c   :  { %v341_v8 = vrot.slane %v340_v1, 4  ;;  %v338_v43 = vrot.slane %v337_v32, 1 }
 0x29e   :  { %v342_v18 = vadd.f32 %v341_v8, %v340_v1  ;;  %v339_v53 = vadd.f32 %v338_v43, %v337_v32 }
 0x2a0   :  { %v295_v60 = vpop.permute.xlu2 %294  ;;  %v260_v61 = vpop.permute.xlu1 %259  ;;  %v343_v29 = vrot.slane %v342_v18, 2 }
 0x2a1   :  { %v304_v62 = vmul.f32 %v260_v61, %v240_v55  ;;  %v253_v63 = vpop.permute.xlu0 %252  ;;  %v309_v2 = vmul.f32 %v295_v60, %v245_v58 }
 0x2a2   :  { %v303_v3 = vmul.f32 %v253_v63, %v239_v59  ;;  %v344_v40 = vadd.f32 %v343_v29, %v342_v18 }
 0x2a3   :  { %v319_v5 = vsel %vm311_vm10, %v304_v62, 0.0  ;;  %v354_v11 = vsel %vm311_vm10, %v309_v2, 0.0 }
 0x2a4   :  { %v320_v6 = vrot.slane %v319_v5, 4  ;;  %v312_v7 = vsel %vm311_vm10, %v303_v3, 0.0  ;;  %v355_v19 = vrot.slane %v354_v11, 4  ;;  %v345_v50 = vrot.slane %v344_v40, 1 }
 0x2a5   :  { %v313_v9 = vrot.slane %v312_v7, 4 }
 0x2a6   :  { %v321_v12 = vadd.f32 %v320_v6, %v319_v5  ;;  %v356_v30 = vadd.f32 %v355_v19, %v354_v11  ;;  %v346_v58 = vadd.f32 %v345_v50, %v344_v40 }
 0x2a7   :  { %v314_v15 = vadd.f32 %v313_v9, %v312_v7 }
 0x2a8   :  { %v322_v16 = vrot.slane %v321_v12, 2  ;;  %v288_v17 = vpop.permute.xlu1 %287  ;;  %v357_v41 = vrot.slane %v356_v30, 2 }
 0x2a9   :  { %v315_v20 = vrot.slane %v314_v15, 2  ;;  %v308_v21 = vmul.f32 %v288_v17, %v244_v13 }
 0x2aa   :  { %v323_v23 = vadd.f32 %v322_v16, %v321_v12  ;;  %v358_v51 = vadd.f32 %v357_v41, %v356_v30 }
 0x2ab   :  { %v316_v25 = vadd.f32 %v315_v20, %v314_v15  ;;  %v347_v26 = vsel %vm311_vm10, %v308_v21, 0.0 }
 0x2ac   :  { %v324_v27 = vrot.slane %v323_v23, 1  ;;  %v348_v28 = vrot.slane %v347_v26, 4  ;;  %v359_v59 = vrot.slane %v358_v51, 1 }
 0x2ad   :  { %v317_v31 = vrot.slane %v316_v25, 1 }
 0x2ae   :  { %v325_v33 = vadd.f32 %v324_v27, %v323_v23  ;;  %v349_v34 = vadd.f32 %v348_v28, %v347_v26  ;;  %v360_v0 = vadd.f32 %v359_v59, %v358_v51 }
 0x2af   :  { %v318_v37 = vadd.f32 %v317_v31, %v316_v25 }
 0x2b0   :  { %v350_v38 = vrot.slane %v349_v34, 2  ;;  %v302_v39 = vpop.permute.xlu1 %301 }
 0x2b1   :  { %v310_v42 = vmul.f32 %v302_v39, %v246_v35  ;;  %v376_v44 = vsel %vm210_vm1, %v325_v33, %v318_v37 }
 0x2b2   :  { %v351_v45 = vadd.f32 %v350_v38, %v349_v34  ;;  %v377_v52 = vsel %vm212_vm2, %v332_v46, %v376_v44 }
 0x2b3   :  { %v361_v47 = vsel %vm311_vm10, %v310_v42, 0.0  ;;  %v378_v57 = vsel %vm214_vm3, %v339_v53, %v377_v52 }
 0x2b4   :  { %v352_v48 = vrot.slane %v351_v45, 1  ;;  %v362_v49 = vrot.slane %v361_v47, 4  ;;  %v379_v61 = vsel %vm216_vm4, %v346_v58, %v378_v57 }
 0x2b6   :  { %v363_v54 = vadd.f32 %v362_v49, %v361_v47  ;;  %v353_v55 = vadd.f32 %v352_v48, %v351_v45 }
 0x2b8   :  { %v364_v56 = vrot.slane %v363_v54, 2  ;;  %v380_v63 = vsel %vm218_vm5, %v353_v55, %v379_v61 }
 0x2b9   :  { %v381_v2 = vsel %vm220_vm6, %v360_v0, %v380_v63 }
 0x2ba   :  { %v365_v60 = vadd.f32 %v364_v56, %v363_v54 }
 0x2bc   :  { %v366_v62 = vrot.slane %v365_v60, 1 }
 0x2be   :  { %v367_v1 = vadd.f32 %v366_v62, %v365_v60 }
 0x2c0   :  { %v382_v3 = vsel %vm222_vm7, %v367_v1, %v381_v2 }
 0x2c1   :  { %384 = vst.msk [vmem:[#allocation8] sm:$0xff] %vm311_vm10, %v382_v3 }
 0x2c2   :  { %395 = dma.vmem_to_hbm [thread:$0]  %s391_s23, 128, %s393_s26, [#allocation4]  }
 0x2c3   :  { %577 = dma.done.wait [#allocation4], 128  }
 0x2c4   :  { %578 = vsyncadd [#allocation4], 4294967168 }
 0x2c5   :  { %579 = dma.done.wait [#allocation10], 128  }
 0x2c6   :  { %580 = vsyncadd [#allocation10], 4294967168 }
 0x2c7   :  { %415 = vsyncpa [#allocation3], 1 }
 0x2c8   :  { %416 = vsyncpa [#allocation6], 1 }
 0x2c9   :  { %417 = vsyncpa [#allocation4], 1 }
 0x2ca   :  { %418 = vsyncpa [#allocation10], 1 }

</bundles_post_ra>
